<compile_context>
chip_gen: v6e
topology: v6e:2x2x1
jax: 0.10.0
libtpu: 0.0.40
codegen_flags: <defaults>
</compile_context>

<pallas_src>
import jax
import jax.numpy as jnp
from jax.experimental import pallas as pl
from jax.experimental.pallas import tpu as pltpu


def _pos_enc_kernel(x_ref, pe_ref, o_ref):
    # x_ref / o_ref: (TB, TN); pe_ref: (1, TN) -> cheap sublane-broadcast add.
    o_ref[...] = x_ref[...] + pe_ref[...]


def _vmem_budget_bytes():
    """(working-set budget, physical capacity) in bytes, generation aware."""
    try:
        cap = int(pltpu.get_tpu_info().vmem_capacity_bytes)
    except Exception:
        cap = 64 << 20  # conservative: v7x per-TC VMEM
    # Keep the double-buffered working set comfortably under capacity
    # (also below v5e/v6e/v7x scoped defaults once we raise vmem_limit_bytes).
    return min(cap // 2, 32 << 20), cap


def learnable_positional_encoding(x, pe, *, min_pallas_bytes=0):
    """x: [B, S, D]; pe: [max_len, 1, D] -> [B, S, D] (eval-mode forward)."""
    B, S, D = x.shape
    max_len = pe.shape[0]
    assert S <= max_len, (
        f"sequence length {S} exceeds positional-encoding max_len {max_len}"
    )
    assert pe.shape[2] == D, "pe embed dim must match x embed dim"

    # PyTorch type promotion (e.g. bf16 x + f32 pe -> f32 result).
    compute_dtype = jnp.promote_types(x.dtype, pe.dtype)
    itemsize = jnp.dtype(compute_dtype).itemsize

    F = S * D
    total_bytes = B * F * itemsize

    # Tiny problems: XLA's fused broadcast-add already runs at roofline; the
    # Pallas custom-call/grid overhead would dominate. Off by default so the
    # kernel always runs in this script.
    if total_bytes < min_pallas_bytes:
        return x.astype(compute_dtype) + pe[:S, 0, :][None].astype(compute_dtype)

    x_flat = x.reshape(B, F).astype(compute_dtype)          # lane-dense view
    pe_flat = pe[:S, 0, :].reshape(1, F).astype(compute_dtype)

    budget, cap = _vmem_budget_bytes()
    sub = {4: 8, 2: 16, 1: 32}.get(itemsize, 8)              # sublane multiple
    row_bytes = F * itemsize

    if budget - 2 * row_bytes >= 4 * row_bytes:
        # ---- Preferred: contiguous batch-row blocks (tb, F); pe resident. ----
        # Working set: 2*(x block) + 2*(out block) + 2*(pe row) <= budget.
        tb_max = (budget - 2 * row_bytes) // (4 * row_bytes)
        if tb_max >= B:
            tb = B
            # Large inputs: keep >= 2 grid steps so both v7x TCs drive DMA.
            if total_bytes > (8 << 20) and B > sub:
                tb = max(sub, pl.cdiv(pl.cdiv(B, 2), sub) * sub)
        else:
            tb = min(B, max(sub, (tb_max // sub) * sub))
        grid = (pl.cdiv(B, tb),)
        in_specs = [
            pl.BlockSpec((tb, F), lambda i: (i, 0)),   # contiguous x row block
            pl.BlockSpec((1, F), lambda i: (0, 0)),    # pe resident across steps
        ]
        out_specs = pl.BlockSpec((tb, F), lambda i: (i, 0))
        block_bytes = tb * row_bytes
        pe_block_bytes = row_bytes
    else:
        # ---- Fallback for huge F: lane-tiled column blocks (B, tn). ----
        # No exact-divisor requirement; ragged last block is masked by Pallas.
        lane_bytes = 128 * itemsize
        per_lane_group = (4 * B + 2) * lane_bytes      # 2x+2out+2pe per 128 lanes
        n_lane_groups = max(1, budget // per_lane_group)
        tn = min(pl.cdiv(F, 128), n_lane_groups) * 128
        grid = (pl.cdiv(F, tn),)
        in_specs = [
            pl.BlockSpec((B, tn), lambda j: (0, j)),
            pl.BlockSpec((1, tn), lambda j: (0, j)),
        ]
        out_specs = pl.BlockSpec((B, tn), lambda j: (0, j))
        block_bytes = B * tn * itemsize
        pe_block_bytes = tn * itemsize

    # Cover double-buffered x + out + pe, with headroom; never exceed physical.
    vmem_limit = int(
        min(cap, max(4 * block_bytes + 2 * pe_block_bytes + (1 << 20), 16 << 20))
    )

    out_flat = pl.pallas_call(
        _pos_enc_kernel,
        out_shape=jax.ShapeDtypeStruct((B, F), compute_dtype),
        grid_spec=pltpu.PrefetchScalarGridSpec(
            num_scalar_prefetch=0,
            grid=grid,
            in_specs=in_specs,
            out_specs=out_specs,
        ),
        compiler_params=pltpu.CompilerParams(
            dimension_semantics=("parallel",),
            vmem_limit_bytes=vmem_limit,
        ),
    )(x_flat, pe_flat)

    return out_flat.reshape(B, S, D)


if __name__ == "__main__":
    # Small shapes consistent with the module's forward: [batch, seq, d_model]
    B, S, D = 2, 8, 32
    MAX_LEN = 64

    key = jax.random.PRNGKey(0)
    kx, kpe = jax.random.split(key)

    x = jax.random.normal(kx, (B, S, D), dtype=jnp.float32)
    # nn.init.uniform_(self.pe, -0.02, 0.02), shape [max_len, 1, d_model]
    pe = jax.random.uniform(kpe, (MAX_LEN, 1, D), dtype=jnp.float32,
                            minval=-0.02, maxval=0.02)

    out = learnable_positional_encoding(x, pe)
    out = jax.block_until_ready(out)

    # Reference check (pure JAX, mirrors PyTorch forward with dropout=identity)
    ref = x + pe[:S, 0, :][None, :, :]
    assert out.shape == (B, S, D)
    assert out.dtype == ref.dtype
    assert jnp.allclose(out, ref, atol=1e-6), "mismatch vs reference"

    print("KERNEL_OK")
</pallas_src>

<mosaic_0001>
module attributes {stable_mosaic.version = 11 : i64} {
  func.func @_pos_enc_kernel(%arg0: i32, %arg1: memref<2x256xf32, #tpu.memory_space<vmem>>, %arg2: memref<1x256xf32, #tpu.memory_space<vmem>>, %arg3: memref<2x256xf32, #tpu.memory_space<vmem>>) attributes {dimension_semantics = [#tpu.dimension_semantics<parallel>], iteration_bounds = array<i64: 1>, scalar_prefetch = 0 : i64, scratch_operands = 0 : i64, tpu.core_type = #tpu.core_type<tc>, window_params = [{transform_indices = @transform_0, window_bounds = array<i64: 2, 256>}, {pipeline_mode = #tpu.pipeline_mode<synchronous>, transform_indices = @transform_1, window_bounds = array<i64: 1, 256>}, {transform_indices = @transform_2, window_bounds = array<i64: 2, 256>}]} {
    %c0 = arith.constant 0 : index
    %c0_0 = arith.constant 0 : index
    %0 = vector.load %arg1[%c0, %c0_0] : memref<2x256xf32, #tpu.memory_space<vmem>>, vector<2x256xf32>
    %c0_1 = arith.constant 0 : index
    %c0_2 = arith.constant 0 : index
    %1 = vector.load %arg2[%c0_1, %c0_2] : memref<1x256xf32, #tpu.memory_space<vmem>>, vector<1x256xf32>
    %2 = vector.broadcast %1 : vector<1x256xf32> to vector<2x256xf32>
    %3 = arith.addf %0, %2 : vector<2x256xf32>
    %c0_3 = arith.constant 0 : index
    %c0_4 = arith.constant 0 : index
    %4 = vector.load %arg3[%c0_3, %c0_4] : memref<2x256xf32, #tpu.memory_space<vmem>>, vector<2x256xf32>
    tpu.vector_store %arg3[%c0_3, %c0_4], %3 {strides = array<i32>} : memref<2x256xf32, #tpu.memory_space<vmem>>, vector<2x256xf32>,
    return
  }
  func.func @transform_0(%arg0: i32) -> (i32, i32) {
    %c0_i32 = arith.constant 0 : i32
    %c0_i32_0 = arith.constant 0 : i32
    return %arg0, %c0_i32 : i32, i32
  }
  func.func @transform_1(%arg0: i32) -> (i32, i32) {
    %c0_i32 = arith.constant 0 : i32
    %c0_i32_0 = arith.constant 0 : i32
    %c0_i32_1 = arith.constant 0 : i32
    return %c0_i32, %c0_i32_0 : i32, i32
  }
  func.func @transform_2(%arg0: i32) -> (i32, i32) {
    %c0_i32 = arith.constant 0 : i32
    %c0_i32_0 = arith.constant 0 : i32
    return %arg0, %c0_i32 : i32, i32
  }
}

</mosaic_0001>

<bundles_post_ra>
// kernel: tpu_custom_call.1
= control target key start
LH: loop header
LB: loop body
LE: loop exit
PB: predicated region body
PF: predicated region fallthrough
CT: control target
= control target key end

     0   :  { %7 = vsyncpa [#allocation3], 0  ;;  %s172_s0 = inlined_call_operand.hbm [shape: f32[2,256], index: 0, kind: input, shape index: {}]   ;;  %s173_s1 = inlined_call_operand.hbm [shape: f32[1,256], index: 1, kind: input, shape index: {}]   ;;  %s174_s2 = inlined_call_operand.hbm [shape: f32[2,256], index: 2, kind: output, shape index: {}]  }
   0x1   :  { %8 = vsyncpa [#allocation6], 0 }
   0x2   :  { %9 = vsyncpa [#allocation4], 0  ;;  %s144_s9 = smov [#allocation2]   ;;  %s145_s11 = smov [#allocation5]  }
   0x3   :  { %s16_s10 = sshll.u32 %s144_s9, 4  ;;  %s26_s12 = sshll.u32 %s145_s11, 4  ;;  %s17_s10 = int_to_ptr.vmem [resolvable:$true] %s16_s10  ;;  %s27_s12 = int_to_ptr.vmem [resolvable:$true] %s26_s12 }
   0x4   :  { %s86_s13 = scalar_lea.vmem %s17_s10, 64  ;;  %p91_p1 = scmp.lt.s32.totalorder %s17_s10, %s17_s10 }
   0x5   :  { %p87_p0 = scmp.ne.s32.totalorder %s17_s10, %s86_s13  ;;  %p92_p2 = scmp.lt.s32.totalorder %s86_s13, %s86_s13 }
   0x7   :  { %p93_p3 = por %p92_p2, %p91_p1 }
   0x9   :  { %p94_p4 = pnand %p93_p3, %p87_p0 }
   0xb   :  { %97 = shalt.err (!%p94_p4)
}
   0xc   :  { %19 = dma.hbm_to_vmem [thread:$0]  %s172_s0, 64, %s17_s10, [#allocation3]  }
   0xd   :  { %s106_s16 = scalar_lea.vmem %s27_s12, 32  ;;  %p111_p6 = scmp.lt.s32.totalorder %s27_s12, %s27_s12 }
   0xe   :  { %p107_p5 = scmp.ne.s32.totalorder %s27_s12, %s106_s16  ;;  %p112_p7 = scmp.lt.s32.totalorder %s106_s16, %s106_s16 }
  0x10   :  { %p113_p8 = por %p112_p7, %p111_p6 }
  0x12   :  { %p114_p9 = pnand %p113_p8, %p107_p5 }
  0x14   :  { %117 = shalt.err (!%p114_p9)
}
  0x15   :  { %29 = dma.hbm_to_vmem [thread:$0]  %s173_s1, 32, %s27_s12, [#allocation6]  }
  0x16   :  { %138 = dma.done.wait [#allocation3], 64  }
  0x17   :  { %139 = vsyncadd [#allocation3], 4294967232 }
  0x18   :  { %140 = dma.done.wait [#allocation6], 32  }
  0x19   :  { %141 = vsyncadd [#allocation6], 4294967264  ;;  %v39_v0 = vlaneseq  ;;  %v146_v1 = vmov 1983009808   ;;  %v37_v7 = vld [vmem:[#allocation5] sm:$0x3] }
  0x1a   :  { %v49_v2 = vunpack.c.l.s4 %v146_v1  ;;  %v36_v12 = vld [vmem:[#allocation2] sm:$0xf]  ;;  %s147_s0 = smov [#allocation7]  }
  0x1b   :  { %v40_v3 = vshrl.u32 %v39_v0, 7  ;;  %s64_s19 = sshll.u32 %s147_s0, 4  ;;  %s65_s19 = int_to_ptr.vmem [resolvable:$true] %s64_s19 }
  0x1c   :  { %v50_v6 = vunpack.c.0.s8 %v49_v2  ;;  %s118_s1 = scalar_lea.vmem %s65_s19, 64  ;;  %p123_p11 = scmp.lt.s32.totalorder %s65_s19, %s65_s19 }
  0x1d   :  { %v41_v4 = vsub.s32 0, %v40_v3  ;;  %v45_v5 = vsub.s32 1, %v40_v3  ;;  %p119_p10 = scmp.ne.s32.totalorder %s65_s19, %s118_s1  ;;  %p124_p12 = scmp.lt.s32.totalorder %s118_s1, %s118_s1 }
  0x1e   :  { %v53_v10 = vsub.s32 %v50_v6, %v40_v3 }
  0x1f   :  { %v42_v8 = vrot.slane %v37_v7, %v41_v4  ;;  %v46_v9 = vrot.slane %v37_v7, %v45_v5  ;;  %p125_p13 = por %p124_p12, %p123_p11 }
  0x21   :  { %v47_v11 = vcombine.low %v42_v8, %v46_v9  ;;  %p126_p0 = pnand %p125_p13, %p119_p10 }
  0x23   :  { %v54_v13 = vrot.slane %v47_v11, %v53_v10 }
  0x25   :  { %v56_v14 = vadd.f32 %v54_v13, %v36_v12 }
  0x27   :  { %57 = vst [vmem:[#allocation7] sm:$0xf] %v56_v14 }
  0x28   :  { %129 = shalt.err (!%p126_p0)
}
  0x29   :  { %67 = dma.vmem_to_hbm [thread:$0]  %s65_s19, 64, %s174_s2, [#allocation4]  }
  0x2a   :  { %142 = dma.done.wait [#allocation4], 64  }
  0x2b   :  { %143 = vsyncadd [#allocation4], 4294967232 }
  0x2c   :  { %71 = vsyncpa [#allocation3], 1 }
  0x2d   :  { %72 = vsyncpa [#allocation6], 1 }
  0x2e   :  { %73 = vsyncpa [#allocation4], 1 }

</bundles_post_ra>
